<compile_context>
chip_gen: v5e
topology: v5e:2x2
jax: 0.10.0
libtpu: 0.0.40
codegen_flags: <defaults>
</compile_context>

<pallas_src>
import math
import functools

import jax
import jax.numpy as jnp
from jax import lax
from jax.experimental import pallas as pl
from jax.experimental.pallas import tpu as pltpu


_VMEM_LIMIT = 32 * 1024 * 1024            # safe scoped-VMEM limit v5e/v6e/v7x
_MAX_TILE_BYTES = 4 * 1024 * 1024         # per-input-tile budget (native dtype)
_FUSE_PER_TENSOR_BYTES = 4 * 1024 * 1024  # single-block fused per-tensor path


def _round_up(a, b):
    return (a + b - 1) // b * b


def _sublane_multiple(dtype):
    return {4: 8, 2: 16, 1: 32}.get(jnp.dtype(dtype).itemsize, 8)


# --------------------------------------------------------------------------
# Kernels
# --------------------------------------------------------------------------
def _quant_rows_kernel(init_ref, x_ref, scale_ref, *out_refs,
                       Qn, Qp, F, inv_f, two_over_sqrt_qp,
                       fused_observer, need_col_mask):
    """One (TC, FB) row tile: optional fused per-row observer + LSQ fake-quant."""
    wq_ref = out_refs[0]
    x = x_ref[...].astype(jnp.float32)              # (TC, FB)
    ax = jnp.abs(x)                                 # shared with observer
    scale_old = scale_ref[...]                      # (TC, 1) f32

    if fused_observer:
        if need_col_mask:                           # mask ragged F edge
            cm = lax.broadcasted_iota(jnp.int32, x.shape, 1) < F
            row_sum = jnp.sum(jnp.where(cm, ax, 0.0), axis=1, keepdims=True)
        else:
            row_sum = jnp.sum(ax, axis=1, keepdims=True)
        absmean = row_sum * inv_f
        obs = absmean * two_over_sqrt_qp
        is_init = init_ref[0] == 1                  # runtime scalar from SMEM
        scale = jnp.where(is_init, obs, 0.9 * scale_old + 0.1 * obs)
        out_refs[1][...] = scale                    # per-channel scale out
    else:
        scale = scale_old

    inv_scale = 1.0 / scale                         # one reciprocal per row
    qa = jnp.floor(ax * inv_scale + 0.5)            # half-away-from-zero magnitude
    q = jnp.clip(jnp.where(x < 0.0, -qa, qa), float(Qn), float(Qp))
    wq_ref[...] = (q * scale).astype(wq_ref.dtype)  # single downcast


def _per_tensor_fused_kernel(init_ref, x_ref, scale_ref, wq_ref, scale_out_ref, *,
                             Qn, Qp, inv_n, two_over_sqrt_qp,
                             C, F, need_row_mask, need_col_mask):
    """Whole-tensor block: per-tensor observer + quantize in one HBM read."""
    x = x_ref[...].astype(jnp.float32)              # (CB, FB)
    ax = jnp.abs(x)

    if need_row_mask or need_col_mask:
        mask = None
        if need_row_mask:
            mask = lax.broadcasted_iota(jnp.int32, x.shape, 0) < C
        if need_col_mask:
            cm = lax.broadcasted_iota(jnp.int32, x.shape, 1) < F
            mask = cm if mask is None else (mask & cm)
        s = jnp.sum(jnp.where(mask, ax, 0.0), keepdims=True)   # (1, 1)
    else:
        s = jnp.sum(ax, keepdims=True)

    absmean = s * inv_n
    obs = absmean * two_over_sqrt_qp
    scale_old = scale_ref[...]                      # (1, 1)
    is_init = init_ref[0] == 1
    scale = jnp.where(is_init, obs, 0.9 * scale_old + 0.1 * obs)
    scale_out_ref[...] = scale

    inv_scale = 1.0 / scale
    qa = jnp.floor(ax * inv_scale + 0.5)
    q = jnp.clip(jnp.where(x < 0.0, -qa, qa), float(Qn), float(Qp))
    wq_ref[...] = (q * scale).astype(wq_ref.dtype)


def _abs_partial_kernel(x_ref, out_ref, *, C, F, TC, need_row_mask, need_col_mask):
    """Pass 1 of the big-tensor per-tensor observer: per-row-tile sum(|x|)."""
    ax = jnp.abs(x_ref[...].astype(jnp.float32))
    mask = None
    if need_row_mask:
        r0 = pl.program_id(0) * TC
        mask = (lax.broadcasted_iota(jnp.int32, ax.shape, 0) + r0) < C
    if need_col_mask:
        cm = lax.broadcasted_iota(jnp.int32, ax.shape, 1) < F
        mask = cm if mask is None else (mask & cm)
    if mask is not None:
        ax = jnp.where(mask, ax, 0.0)
    out_ref[...] = jnp.sum(ax, keepdims=True)[None]   # (1, 1, 1)


# --------------------------------------------------------------------------
# Jitted forward (stable shapes across observer calls -> no recompiles)
# --------------------------------------------------------------------------
@functools.partial(jax.jit, static_argnums=(3, 4, 5, 6, 7))
def _lsq_forward(x, scale_full, init_flag, Qn, Qp, per_channel, observer,
                 force_two_pass):
    orig_shape = x.shape
    orig_dtype = x.dtype
    C = int(orig_shape[0])
    F = 1
    for d in orig_shape[1:]:
        F *= int(d)
    x2 = x.reshape(C, F)                       # row-major collapse: no HBM copy
    scale_full = scale_full.astype(jnp.float32)

    itemsize = jnp.dtype(orig_dtype).itemsize
    sub = _sublane_multiple(orig_dtype)        # dtype-aware sublane packing
    FB = _round_up(F, 128)                     # lane-aligned block width
    need_col_mask = FB != F

    rows_fit = max(sub, (_MAX_TILE_BYTES // (FB * itemsize)) // sub * sub)
    TC = min(_round_up(C, sub), rows_fit)
    n_tiles = pl.cdiv(C, TC)

    init_arr = init_flag.astype(jnp.int32).reshape(1)
    two_over_sqrt_qp = 2.0 / math.sqrt(Qp)
    row_params = pltpu.CompilerParams(dimension_semantics=("parallel",),
                                      vmem_limit_bytes=_VMEM_LIMIT)

    if observer and not per_channel:
        CB = _round_up(C, sub)
        fits = (CB * FB * itemsize) <= _FUSE_PER_TENSOR_BYTES
        if fits and not force_two_pass:
            # ---- single fused pass: observer + quantize, one HBM read ----
            kernel = functools.partial(
                _per_tensor_fused_kernel, Qn=Qn, Qp=Qp,
                inv_n=1.0 / float(C * F), two_over_sqrt_qp=two_over_sqrt_qp,
                C=C, F=F, need_row_mask=(CB != C), need_col_mask=need_col_mask)
            wq, scale_out = pl.pallas_call(
                kernel,
                out_shape=(jax.ShapeDtypeStruct((C, F), orig_dtype),
                           jax.ShapeDtypeStruct((1, 1), jnp.float32)),
                grid_spec=pltpu.PrefetchScalarGridSpec(
                    num_scalar_prefetch=1,
                    grid=(1,),
                    in_specs=[pl.BlockSpec((CB, FB), lambda i, init: (0, 0)),
                              pl.BlockSpec((1, 1), lambda i, init: (0, 0))],
                    out_specs=(pl.BlockSpec((CB, FB), lambda i, init: (0, 0)),
                               pl.BlockSpec((1, 1), lambda i, init: (0, 0)))),
                compiler_params=pltpu.CompilerParams(
                    dimension_semantics=("arbitrary",),
                    vmem_limit_bytes=_VMEM_LIMIT),
            )(init_arr, x2, scale_full[:1].reshape(1, 1))
            return wq.reshape(orig_shape), scale_out.reshape(1)

        # ---- big tensor: pass 1 emits per-tile partial sums (parallel) ----
        partials = pl.pallas_call(
            functools.partial(_abs_partial_kernel, C=C, F=F, TC=TC,
                              need_row_mask=(C % TC != 0),
                              need_col_mask=need_col_mask),
            out_shape=jax.ShapeDtypeStruct((n_tiles, 1, 1), jnp.float32),
            grid=(n_tiles,),
            in_specs=[pl.BlockSpec((TC, FB), lambda i: (i, 0))],
            out_specs=pl.BlockSpec((1, 1, 1), lambda i: (i, 0, 0)),
            compiler_params=row_params,
        )(x2)
        absmean = jnp.sum(partials) / float(C * F)
        obs = absmean * 2.0 / math.sqrt(Qp)
        new_scale = jnp.where(init_flag == 1, obs,
                              0.9 * scale_full[0] + 0.1 * obs)
        scale_rows = jnp.broadcast_to(new_scale, (C, 1)).astype(jnp.float32)
        fused_observer = False
        ret_scale = new_scale.reshape(1)
    else:
        # per-row scale input; for per-tensor this is a tiny (C,1) broadcast.
        scale_rows = scale_full.reshape(C, 1)
        fused_observer = bool(observer and per_channel)
        ret_scale = None

    kernel = functools.partial(
        _quant_rows_kernel, Qn=Qn, Qp=Qp, F=F, inv_f=1.0 / float(F),
        two_over_sqrt_qp=two_over_sqrt_qp, fused_observer=fused_observer,
        need_col_mask=need_col_mask)

    if fused_observer:
        out_shape = (jax.ShapeDtypeStruct((C, F), orig_dtype),
                     jax.ShapeDtypeStruct((C, 1), jnp.float32))
        out_specs = (pl.BlockSpec((TC, FB), lambda i, init: (i, 0)),
                     pl.BlockSpec((TC, 1), lambda i, init: (i, 0)))
    else:  # skip the scale output entirely when there is nothing to observe
        out_shape = jax.ShapeDtypeStruct((C, F), orig_dtype)
        out_specs = pl.BlockSpec((TC, FB), lambda i, init: (i, 0))

    res = pl.pallas_call(
        kernel,
        out_shape=out_shape,
        grid_spec=pltpu.PrefetchScalarGridSpec(
            num_scalar_prefetch=1,
            grid=(n_tiles,),
            in_specs=[pl.BlockSpec((TC, FB), lambda i, init: (i, 0)),
                      pl.BlockSpec((TC, 1), lambda i, init: (i, 0))],
            out_specs=out_specs),
        compiler_params=row_params,
    )(init_arr, x2, scale_rows)

    if fused_observer:
        wq, scale_out = res
        return wq.reshape(orig_shape), scale_out[:, 0]
    wq = res
    if ret_scale is not None:                 # per-tensor observer, 2-pass
        return wq.reshape(orig_shape), ret_scale
    return wq.reshape(orig_shape), scale_full[:1]      # scale unchanged


# --------------------------------------------------------------------------
# Module wrapper
# --------------------------------------------------------------------------
class LSQWeightQuantizer:
    """JAX/Pallas port of the PyTorch LSQWeightQuantizer forward pass."""

    def __init__(self, bits, qtype='qint', per_channel=False, quant=False,
                 observer=False, learning=False):
        assert bits != 1, "LSQ don't support binary quantization"
        assert qtype in ('qint', 'quint'), 'qtype just support qint or quint'
        self.bits = bits
        self.qtype = qtype
        self.quant = quant
        self.observer = observer
        self.learning = learning
        if qtype == 'quint':
            self.Qn = 0
            self.Qp = 2 ** bits - 1
        else:
            self.Qn = -2 ** (bits - 1)
            self.Qp = 2 ** (bits - 1) - 1
        self.per_channel = per_channel
        # torch: self.scale = nn.Parameter(torch.ones(1))
        self.scale = jnp.ones((1,), dtype=jnp.float32)
        self.grad_factor = 1.0
        self.observer_init = 1

    def __call__(self, x):
        if not self.quant:
            return x
        self.grad_factor = 1.0 / math.sqrt(x.size * self.Qp)
        if not (self.observer or self.learning):
            return x

        C = x.shape[0]
        # Broadcast stored scale to (C,) so the jitted path sees stable shapes
        # whether the stored scale is (1,) (initial / per-tensor) or (C,).
        scale_full = jnp.broadcast_to(
            jnp.asarray(self.scale, jnp.float32).reshape(-1), (C,))
        init_flag = jnp.asarray(self.observer_init, jnp.int32)

        wq, new_scale = _lsq_forward(x, scale_full, init_flag,
                                     self.Qn, self.Qp,
                                     self.per_channel, self.observer, False)
        if self.observer:
            self.scale = new_scale
            self.observer_init = 0
        return wq


# ----------------------- pure-JAX reference (for checking) -----------------
def _ref_forward(x, scale, Qn, Qp, per_channel, observer, observer_init):
    C = x.shape[0]
    x2 = x.reshape(C, -1).astype(jnp.float32)
    scale = scale.astype(jnp.float32)
    if observer:
        if per_channel:
            am = jnp.mean(jnp.abs(x2), axis=1)
        else:
            am = jnp.mean(jnp.abs(x2)).reshape(1)
        obs = am * 2.0 / math.sqrt(Qp)
        scale = obs if observer_init == 1 else 0.9 * scale + 0.1 * obs
    alpha = scale.reshape(-1, 1)
    q = x2 / alpha
    q = jnp.clip(jnp.sign(q) * jnp.floor(jnp.abs(q) + 0.5), Qn, Qp)
    return (q * alpha).reshape(x.shape).astype(x.dtype), scale


if __name__ == "__main__":
    key = jax.random.PRNGKey(0)
    # Conv weight, PyTorch layout (Cout, Cin, KH, KW)
    w = jax.random.normal(key, (8, 4, 3, 3), dtype=jnp.float32)

    ok = True

    # ---- per-tensor, 8-bit signed, observer on (fused single-pass path) ----
    qt = LSQWeightQuantizer(bits=8, qtype='qint', per_channel=False,
                            quant=True, observer=True, learning=False)
    ref_scale = jnp.ones((1,), jnp.float32)
    ref_init = 1
    for _ in range(2):
        out = qt(w)
        jax.block_until_ready(out)
        ref_out, ref_scale = _ref_forward(w, ref_scale, qt.Qn, qt.Qp,
                                          False, True, ref_init)
        ref_init = 0
        ok &= bool(jnp.allclose(out, ref_out, atol=1e-5, rtol=1e-5))
        ok &= bool(jnp.allclose(qt.scale, ref_scale, atol=1e-6, rtol=1e-5))

    # ---- per-channel, 4-bit signed, observer on: two calls (init + EMA) ----
    qt_pc = LSQWeightQuantizer(bits=4, qtype='qint', per_channel=True,
                               quant=True, observer=True, learning=False)
    ref_scale_pc = jnp.ones((1,), jnp.float32)
    ref_init = 1
    for _ in range(2):
        out_pc = qt_pc(w)
        jax.block_until_ready(out_pc)
        ref_out_pc, ref_scale_pc = _ref_forward(w, ref_scale_pc, qt_pc.Qn,
                                                qt_pc.Qp, True, True, ref_init)
        ref_init = 0
        ok &= bool(jnp.allclose(out_pc, ref_out_pc, atol=1e-5, rtol=1e-5))
        ok &= bool(jnp.allclose(qt_pc.scale, ref_scale_pc, atol=1e-6, rtol=1e-5))

    # ---- learning-only path (no observer): quantize with the stored scale ----
    qt_l = LSQWeightQuantizer(bits=8, qtype='quint', per_channel=False,
                              quant=True, observer=False, learning=True)
    out_l = qt_l(w)
    jax.block_until_ready(out_l)
    ref_out_l, _ = _ref_forward(w, jnp.ones((1,), jnp.float32),
                                qt_l.Qn, qt_l.Qp, False, False, 0)
    ok &= bool(jnp.allclose(out_l, ref_out_l, atol=1e-5, rtol=1e-5))

    # ---- native-dtype I/O path: bf16 weights, per-channel observer ----
    w_bf16 = w.astype(jnp.bfloat16)
    qt_bf = LSQWeightQuantizer(bits=8, qtype='qint', per_channel=True,
                               quant=True, observer=True, learning=False)
    out_bf = qt_bf(w_bf16)
    jax.block_until_ready(out_bf)
    ref_out_bf, ref_scale_bf = _ref_forward(w_bf16, jnp.ones((1,), jnp.float32),
                                            qt_bf.Qn, qt_bf.Qp, True, True, 1)
    ok &= bool(out_bf.dtype == jnp.bfloat16)
    ok &= bool(jnp.allclose(out_bf.astype(jnp.float32),
                            ref_out_bf.astype(jnp.float32),
                            atol=5e-2, rtol=5e-2))
    ok &= bool(jnp.allclose(qt_bf.scale, ref_scale_bf, atol=1e-5, rtol=1e-5))

    # ---- forced two-pass per-tensor observer (the large-tensor code path) ----
    scale_b2 = jnp.ones((1,), jnp.float32)
    ref_scale_b2 = jnp.ones((1,), jnp.float32)
    init = 1
    for _ in range(2):
        scale_full_b2 = jnp.broadcast_to(scale_b2.reshape(-1), (w.shape[0],))
        wq_b2, scale_b2 = _lsq_forward(w, scale_full_b2,
                                       jnp.asarray(init, jnp.int32),
                                       -128, 127, False, True, True)
        jax.block_until_ready(wq_b2)
        ref_out_b2, ref_scale_b2 = _ref_forward(w, ref_scale_b2, -128, 127,
                                                False, True, init)
        init = 0
        ok &= bool(jnp.allclose(wq_b2, ref_out_b2, atol=1e-5, rtol=1e-5))
        ok &= bool(jnp.allclose(scale_b2, ref_scale_b2, atol=1e-6, rtol=1e-5))

    if ok:
        print("KERNEL_OK")
    else:
        print("MISMATCH")
</pallas_src>

<mosaic_0001>
module attributes {stable_mosaic.version = 11 : i64} {
  func.func @_per_tensor_fused_kernel(%arg0: i32, %arg1: memref<1xi32, #tpu.memory_space<smem>>, %arg2: memref<8x128xf32, #tpu.memory_space<vmem>>, %arg3: memref<1x1xf32, #tpu.memory_space<vmem>>, %arg4: memref<8x128xf32, #tpu.memory_space<vmem>>, %arg5: memref<1x1xf32, #tpu.memory_space<vmem>>) attributes {dimension_semantics = [#tpu.dimension_semantics<arbitrary>], iteration_bounds = array<i64: 1>, scalar_prefetch = 1 : i64, scratch_operands = 0 : i64, tpu.core_type = #tpu.core_type<tc>, window_params = [{transform_indices = @transform_0, window_bounds = array<i64: 8, 128>}, {pipeline_mode = #tpu.pipeline_mode<synchronous>, transform_indices = @transform_1, window_bounds = array<i64: 1, 1>}, {transform_indices = @transform_2, window_bounds = array<i64: 8, 128>}, {pipeline_mode = #tpu.pipeline_mode<synchronous>, transform_indices = @transform_3, window_bounds = array<i64: 1, 1>}]} {
    %c0 = arith.constant 0 : index
    %c0_0 = arith.constant 0 : index
    %0 = vector.load %arg2[%c0, %c0_0] : memref<8x128xf32, #tpu.memory_space<vmem>>, vector<8x128xf32>
    %1 = math.absf %0 : vector<8x128xf32>
    %2 = tpu.iota {dimensions = array<i32: 1>} : vector<8x128xi32>
    %c36_i32 = arith.constant 36 : i32
    %3 = vector.broadcast %c36_i32 : i32 to vector<8x128xi32>
    %4 = arith.cmpi slt, %2, %3 : vector<8x128xi32>
    %cst = arith.constant 0.000000e+00 : f32
    %5 = vector.broadcast %cst : f32 to vector<8x128xf32>
    %6 = arith.select %4, %1, %5 : vector<8x128xi1>, vector<8x128xf32>
    %7 = vector.shape_cast %6 : vector<8x128xf32> to vector<1x8x128xf32>
    %cst_1 = arith.constant dense<0.000000e+00> : vector<1xf32>
    %8 = vector.multi_reduction <add>, %7, %cst_1 [1, 2] : vector<1x8x128xf32> to vector<1xf32>
    %9 = vector.shape_cast %8 : vector<1xf32> to vector<1x1x1xf32>
    %10 = vector.extract %9[0, 0, 0] : f32 from vector<1x1x1xf32>
    %11 = vector.broadcast %10 : f32 to vector<1x1xf32>
    %cst_2 = arith.constant 0.00347222225 : f32
    %12 = vector.broadcast %cst_2 : f32 to vector<1x1xf32>
    %13 = arith.mulf %11, %12 : vector<1x1xf32>
    %cst_3 = arith.constant 0.177471295 : f32
    %14 = vector.broadcast %cst_3 : f32 to vector<1x1xf32>
    %15 = arith.mulf %13, %14 : vector<1x1xf32>
    %c0_4 = arith.constant 0 : index
    %c0_5 = arith.constant 0 : index
    %16 = vector.load %arg3[%c0_4, %c0_5] : memref<1x1xf32, #tpu.memory_space<vmem>>, vector<1x1xf32>
    %c0_6 = arith.constant 0 : index
    %17 = memref.load %arg1[%c0_6] : memref<1xi32, #tpu.memory_space<smem>>
    %c1_i32 = arith.constant 1 : i32
    %18 = arith.cmpi eq, %17, %c1_i32 : i32
    %cst_7 = arith.constant 0.899999976 : f32
    %19 = vector.broadcast %cst_7 : f32 to vector<1x1xf32>
    %20 = arith.mulf %19, %16 : vector<1x1xf32>
    %cst_8 = arith.constant 1.000000e-01 : f32
    %21 = vector.broadcast %cst_8 : f32 to vector<1x1xf32>
    %22 = arith.mulf %21, %15 : vector<1x1xf32>
    %23 = arith.addf %20, %22 : vector<1x1xf32>
    %24 = arith.select %18, %15, %23 : vector<1x1xf32>
    %c0_9 = arith.constant 0 : index
    %c0_10 = arith.constant 0 : index
    %25 = vector.load %arg5[%c0_9, %c0_10] : memref<1x1xf32, #tpu.memory_space<vmem>>, vector<1x1xf32>
    tpu.vector_store %arg5[%c0_9, %c0_10], %24 {strides = array<i32>} : memref<1x1xf32, #tpu.memory_space<vmem>>, vector<1x1xf32>,
    %cst_11 = arith.constant 1.000000e+00 : f32
    %26 = vector.broadcast %cst_11 : f32 to vector<1x1xf32>
    %27 = arith.divf %26, %24 : vector<1x1xf32>
    %28 = vector.broadcast %27 : vector<1x1xf32> to vector<8x128xf32>
    %29 = arith.mulf %1, %28 : vector<8x128xf32>
    %cst_12 = arith.constant 5.000000e-01 : f32
    %30 = vector.broadcast %cst_12 : f32 to vector<8x128xf32>
    %31 = arith.addf %29, %30 : vector<8x128xf32>
    %32 = math.floor %31 : vector<8x128xf32>
    %cst_13 = arith.constant 0.000000e+00 : f32
    %33 = vector.broadcast %cst_13 : f32 to vector<8x128xf32>
    %34 = arith.cmpf olt, %0, %33 : vector<8x128xf32>
    %cst_14 = arith.constant 0.000000e+00 : f32
    %35 = vector.broadcast %cst_14 : f32 to vector<8x128xf32>
    %36 = arith.subf %35, %32 : vector<8x128xf32>
    %37 = arith.select %34, %36, %32 : vector<8x128xi1>, vector<8x128xf32>
    %cst_15 = arith.constant -1.280000e+02 : f32
    %cst_16 = arith.constant 1.270000e+02 : f32
    %38 = vector.broadcast %cst_15 : f32 to vector<8x128xf32>
    %39 = arith.maximumf %38, %37 : vector<8x128xf32>
    %40 = vector.broadcast %cst_16 : f32 to vector<8x128xf32>
    %41 = arith.minimumf %40, %39 : vector<8x128xf32>
    %42 = vector.broadcast %24 : vector<1x1xf32> to vector<8x128xf32>
    %43 = arith.mulf %41, %42 : vector<8x128xf32>
    %c0_17 = arith.constant 0 : index
    %c0_18 = arith.constant 0 : index
    %44 = vector.load %arg4[%c0_17, %c0_18] : memref<8x128xf32, #tpu.memory_space<vmem>>, vector<8x128xf32>
    tpu.vector_store %arg4[%c0_17, %c0_18], %43 {strides = array<i32>} : memref<8x128xf32, #tpu.memory_space<vmem>>, vector<8x128xf32>,
    return
  }
  func.func @transform_0(%arg0: i32, %arg1: memref<1xi32, #tpu.memory_space<smem>>) -> (i32, i32) {
    %c0_i32 = arith.constant 0 : i32
    %c0_i32_0 = arith.constant 0 : i32
    %c0_i32_1 = arith.constant 0 : i32
    return %c0_i32, %c0_i32_0 : i32, i32
  }
  func.func @transform_1(%arg0: i32, %arg1: memref<1xi32, #tpu.memory_space<smem>>) -> (i32, i32) {
    %c0_i32 = arith.constant 0 : i32
    %c0_i32_0 = arith.constant 0 : i32
    %c0_i32_1 = arith.constant 0 : i32
    return %c0_i32, %c0_i32_0 : i32, i32
  }
  func.func @transform_2(%arg0: i32, %arg1: memref<1xi32, #tpu.memory_space<smem>>) -> (i32, i32) {
    %c0_i32 = arith.constant 0 : i32
    %c0_i32_0 = arith.constant 0 : i32
    %c0_i32_1 = arith.constant 0 : i32
    return %c0_i32, %c0_i32_0 : i32, i32
  }
  func.func @transform_3(%arg0: i32, %arg1: memref<1xi32, #tpu.memory_space<smem>>) -> (i32, i32) {
    %c0_i32 = arith.constant 0 : i32
    %c0_i32_0 = arith.constant 0 : i32
    %c0_i32_1 = arith.constant 0 : i32
    return %c0_i32, %c0_i32_0 : i32, i32
  }
}

</mosaic_0001>

<bundles_post_ra>
// kernel: _lsq_forward.1
= control target key start
LH: loop header
LB: loop body
LE: loop exit
PB: predicated region body
PF: predicated region fallthrough
CT: control target
= control target key end

     0   :  { %s185_s0 = inlined_call_operand.<no memory space> [shape: s32[1], index: 0, kind: input, shape index: {}]   ;;  %s186_s1 = inlined_call_operand.vmem [shape: f32[8,36], index: 1, kind: input, shape index: {}]   ;;  %s187_s2 = inlined_call_operand.<no memory space> [shape: f32[1,1], index: 2, kind: input, shape index: {}]   ;;  %s188_s3 = inlined_call_operand.vmem [shape: f32[8,36], index: 3, kind: output, shape index: {0}]   ;;  %s189_s4 = inlined_call_operand.hbm [shape: f32[1,1], index: 4, kind: output, shape index: {1}]  }
   0x1   :  { %v11_v0 = vstv %s187_s2 }
   0x2   :  { %12 = vst [vmem:[#allocation4] sm:$0x1] %v11_v0 }
   0x3   :  { %v172_v1 = vld [vmem:[%s186_s1] sm:$0xff]  ;;  %v20_v2 = vlaneseq }
   0x4   :  { %13 = vsyncpa [#allocation6], 0  ;;  %v19_v3 = vand.u32 2147483647, %v172_v1  ;;  %v139_v13 = vmov 0   ;;  %p38_p0 = scmp.eq.s32.totalorder %s185_s0, 1 }
   0x5   :  { %v21_v4 = vand.u32 127, %v20_v2  ;;  %110 = vset.pattern.permute.xlu1 %v139_v13  ;;  %109 = vset.pattern.permute.xlu0 %v139_v13  ;;  %vm46_vm2 = vcmask 0   ;;  %s140_s0 = smov [#allocation5]   ;;  %s94_s24 = sshll.u32 %s189_s4, 4  ;;  %vm72_vm7 = vcmp.lt.f32.partialorder %v172_v1, 0.0  ;;  %s95_s24 = int_to_ptr.hbm [resolvable:$true] %s94_s24 }
   0x6   :  { %s42_s19 = scalar_select %p38_p0, 1, 0 }
   0x7   :  { %vm22_vm0 = vcmp.lt.s32.totalorder %v21_v4, 36  ;;  %s92_s21 = sshll.u32 %s140_s0, 4  ;;  %s93_s21 = int_to_ptr.vmem [resolvable:$true] %s92_s21 }
   0x8   :  { %v23_v5 = vsel %vm22_vm0, %v19_v3, 0.0  ;;  %v43_v19 = vstv %s42_s19 }
   0x9   :  { %24 = vadd.xlane.f32.xlu0 %v23_v5  ;;  %v36_v15 = vld [vmem:[#allocation4] sm:$0x1]  ;;  %vm44_vm1 = vcmp.eq.s32.totalorder %v43_v19, 1 }
   0xa   :  { %v39_v18 = vmul.f32 0.9, %v36_v15 }
  0x7c   :  { %v25_v6 = vpop.xlane.xlu0 %24 }
  0x7d   :  { %v26_v7 = vrot.slane %v25_v6, 4 }
  0x7f   :  { %v27_v8 = vadd.f32 %v26_v7, %v25_v6 }
  0x81   :  { %v28_v9 = vrot.slane %v27_v8, 2 }
  0x83   :  { %v29_v10 = vadd.f32 %v28_v9, %v27_v8 }
  0x85   :  { %v30_v11 = vrot.slane %v29_v10, 1 }
  0x87   :  { %v31_v12 = vadd.f32 %v30_v11, %v29_v10 }
  0x89   :  { %105 = vpush %v31_v12 }
  0xba   :  { %s106_s20 = spop %105 }
  0xbb   :  { %v33_v14 = vstv %s106_s20 }
  0xbc   :  { %v34_v16 = vmul.f32 0.0034722222, %v33_v14 }
  0xbe   :  { %v35_v17 = vmul.f32 0.1774713, %v34_v16 }
  0xc0   :  { %v40_v20 = vmul.f32 0.1, %v35_v17 }
  0xc2   :  { %v41_v21 = vadd.f32 %v40_v20, %v39_v18 }
  0xc4   :  { %v45_v22 = vsel %vm44_vm1, %v35_v17, %v41_v21 }
  0xc5   :  { %111 = vrcp.f32 %v45_v22  ;;  %v78_v23 = vperm.slane %v45_v22, 0  ;;  %47 = vst.msk [vmem:[#allocation5] sm:$0x1] %vm46_vm2, %v45_v22  ;;  %v59_v27 = vand.u32 2147483648, %v45_v22  ;;  %v57_v29 = vand.u32 2147483647, %v45_v22 }
  0xc6   :  { %vm53_vm4 = vweird.f32 %v45_v22  ;;  %97 = dma.vmem_to_hbm [thread:$0]  %s93_s21, 16, %s95_s24, [#allocation6]  }
  0xc7   :  { %80 = vperm.xlu1 %110, %v78_v23   ;;  %v60_v31 = vor.u32 1.1754944e-38, %v59_v27  ;;  %vm58_vm6 = vcmp.eq.f32.partialorder %v57_v29, 8.507059e+37 }
  0xcb   :  { %v112_v24 = vpop.eup %111 }
  0xcc   :  { %v49_v25 = vmul.f32 %v112_v24, %v45_v22  ;;  %vm54_vm3 = vweird.f32 %v112_v24 }
  0xcd   :  { %vm55_vm5 = vmor %vm53_vm4, %vm54_vm3 }
  0xce   :  { %v50_v26 = vsub.f32 1.0, %v49_v25 }
  0xd0   :  { %v51_v28 = vmul.f32 %v112_v24, %v50_v26 }
  0xd2   :  { %v52_v30 = vadd.f32 %v112_v24, %v51_v28 }
  0xd4   :  { %v56_v32 = vsel %vm55_vm5, %v112_v24, %v52_v30 }
  0xd5   :  { %v61_v33 = vsel %vm58_vm6, %v60_v31, %v56_v32 }
  0xd6   :  { %v64_v34 = vperm.slane %v61_v33, 0 }
  0xd8   :  { %66 = vperm.xlu0 %109, %v64_v34  }
 0x139   :  { %v81_v43 = vpop.permute.xlu1 %80 }
 0x14a   :  { %v67_v35 = vpop.permute.xlu0 %66 }
 0x14b   :  { %v69_v36 = vmul.f32 %v67_v35, %v19_v3 }
 0x14d   :  { %v70_v37 = vadd.f32 0.5, %v69_v36 }
 0x14f   :  { %v71_v38 = vfloor.f32 %v70_v37 }
 0x151   :  { %v73_v39 = vsub.f32 0.0, %v71_v38 }
 0x153   :  { %v74_v40 = vsel %vm72_vm7, %v73_v39, %v71_v38 }
 0x154   :  { %v75_v41 = vmax.f32 %v74_v40, -128.0 }
 0x156   :  { %v76_v42 = vmin.f32 %v75_v41, 127.0 }
 0x158   :  { %v83_v44 = vmul.f32 %v81_v43, %v76_v42 }
 0x15a   :  { %84 = vst [vmem:[%s188_s3] sm:$0xff] %v83_v44 }
 0x15b   :  { %137 = dma.done.wait [#allocation6], 16  }
 0x15c   :  { %138 = vsyncadd [#allocation6], 4294967280 }
 0x15d   :  { %104 = vsyncpa [#allocation6], 1 }

</bundles_post_ra>
